<compile_context>
chip_gen: v7x
topology: tpu7x:2x2x1
jax: 0.10.0
libtpu: 0.0.40
codegen_flags: <defaults>
</compile_context>

<pallas_src>
import functools

import jax
import jax.numpy as jnp
from jax.experimental import pallas as pl
from jax.experimental.pallas import tpu as pltpu


def attention_kernel(x_ref, wqkv_ref, bqkv_ref, pos_ref, wproj_ref, bproj_ref,
                     o_ref, z_ref, *, num_head, dim_head, mxu_dtype):
    """One grid step: `tb` independent (s, e) attention windows."""
    tb, s, e = x_ref.shape
    m = tb * s
    hd = num_head * dim_head

    # x stays f32 in HBM; cast to the MXU operand dtype on the VPU (hides under
    # the MXU and avoids a separate wrapper cast pass over HBM).
    x2 = x_ref[...].reshape(m, e).astype(mxu_dtype)

    # Single fused Q/K/V projection: (m, e) @ (e, 3*hd)  -> N = 3*hd per push.
    # Softmax scale is pre-folded into the Q columns/bias by the wrapper;
    # bias add and accumulation stay f32.
    qkv = jnp.dot(x2, wqkv_ref[...], preferred_element_type=jnp.float32) + bqkv_ref[0]

    # TODO(synk): for large num_head switch to lax.fori_loop + head-major (H, m, D)
    #   activations; at dim_head=8 (< 128 lanes) every head-major relayout costs
    #   more than these static lane slices, which become lane-aligned (free) once
    #   dim_head is a multiple of 128.
    for h in range(num_head):
        lo = h * dim_head
        qh = qkv[:, lo:lo + dim_head].reshape(tb, s, dim_head).astype(mxu_dtype)
        kh = qkv[:, hd + lo:hd + lo + dim_head].reshape(tb, s, dim_head).astype(mxu_dtype)
        vh = qkv[:, 2 * hd + lo:2 * hd + lo + dim_head].reshape(tb, s, dim_head).astype(mxu_dtype)

        att = jnp.einsum('bqd,bkd->bqk', qh, kh,
                         preferred_element_type=jnp.float32)        # (tb, s, s)
        att = att + pos_ref[h]                                      # positional bias
        att = att - jnp.max(att, axis=-1, keepdims=True)            # stable f32 softmax
        p = jnp.exp(att)
        p = p * pl.reciprocal(jnp.sum(p, axis=-1, keepdims=True), approx=True)
        # TODO(synk): dropout (training mode) and the optional additive mask are
        #   not implemented (eval mode, mask=None only).

        zh = jnp.einsum('bqk,bkd->bqd', p.astype(mxu_dtype), vh,
                        preferred_element_type=jnp.float32)         # (tb, s, D)
        # Gather every head into one (m, hd) scratch so the output projection is
        # a single K=hd matmul instead of per-head K=dim_head pushes.
        z_ref[:, lo:lo + dim_head] = zh.reshape(m, dim_head)

    out = jnp.dot(z_ref[...].astype(mxu_dtype), wproj_ref[...],
                  preferred_element_type=jnp.float32) + bproj_ref[0]
    # Lane-dense store when o_ref is (1, tb, s*e); plain (1, tb, s, e) in fallback.
    o_ref[...] = out.reshape(o_ref.shape).astype(o_ref.dtype)


def attention_forward(x, wq, bq, wk, bk, wv, bv, pos_bias, wproj, bproj,
                      *, num_head, dim_head, use_bf16=False,
                      max_rows_per_step=512, min_grid_steps=4):
    b, w, s, e = x.shape
    B = b * w
    hd = num_head * dim_head
    scale = dim_head ** (-0.5)

    # Fuse Q/K/V into one (e, 3*hd) weight / (1, 3*hd) bias; fold the softmax
    # scale into the Q slab (zero in-kernel cost).
    w_qkv = jnp.concatenate([wq * scale, wk, wv], axis=1)
    b_qkv = jnp.concatenate([bq * scale, bk, bv], axis=1)

    if use_bf16:
        # Only resident weight matrices are pre-cast; x is cast in-kernel and all
        # softmax / accumulation math stays f32 (v5e has no bf16 VPU/EUP).
        mxu_dtype = jnp.bfloat16
        w_qkv_m = w_qkv.astype(jnp.bfloat16)
        wproj_m = wproj.astype(jnp.bfloat16)
    else:
        mxu_dtype = jnp.float32
        w_qkv_m = w_qkv
        wproj_m = wproj

    # ---- Tile sizing: VMEM-budgeted rows per step, >= min_grid_steps steps ----
    try:
        vmem_cap = int(pltpu.get_tpu_info().vmem_capacity_bytes)
    except Exception:
        vmem_cap = 64 * 2 ** 20          # v7x per-core VMEM (smallest modern part)
    budget = vmem_cap // 2               # headroom for double buffers / compiler scratch

    def vmem_estimate(tb_):
        m_ = tb_ * s
        resident = 2 * 4 * (e * 3 * hd + 3 * hd + num_head * s * s + hd * e + e)
        tiles = 2 * 4 * (tb_ * s * e) * 2                 # double-buffered in/out tiles
        temps = 4 * (m_ * 3 * hd + m_ * hd + m_ * e) + 4 * num_head * tb_ * s * s
        return resident + tiles + temps

    min_steps = max(1, min(min_grid_steps, B))
    tb = max(1, min(max(1, max_rows_per_step // s), B // min_steps))
    while tb > 1 and vmem_estimate(tb) > budget:
        tb = max(1, tb // 2)
    n_blocks = -(-B // tb)               # cdiv; >= min_steps by construction
    B_pad = n_blocks * tb

    xf = x.reshape(B, s, e)
    if B_pad != B:
        # Pad with zero windows (computed then trimmed) rather than collapsing to
        # tb=1 when B has no convenient divisor.
        xf = jnp.concatenate([xf, jnp.zeros((B_pad - B, s, e), xf.dtype)], axis=0)

    kernel = functools.partial(attention_kernel, num_head=num_head,
                               dim_head=dim_head, mxu_dtype=mxu_dtype)

    def full_spec(shape):
        n = len(shape)
        return pl.BlockSpec(shape, lambda i, _n=n: (0,) * _n)

    def nbytes(t):
        return int(t.size) * jnp.dtype(t.dtype).itemsize

    flops = (2 * B_pad * s * e * 3 * hd                        # fused qkv projection
             + 2 * 2 * B_pad * num_head * s * s * dim_head     # q@k^T and p@v
             + 2 * B_pad * s * hd * e)                         # output projection
    transcendentals = B_pad * num_head * s * s + B_pad * num_head * s
    bytes_accessed = (nbytes(xf) + B_pad * s * e * jnp.dtype(x.dtype).itemsize
                      + sum(nbytes(t) for t in (w_qkv_m, b_qkv, pos_bias,
                                                wproj_m, bproj)))
    cost = pl.CostEstimate(flops=flops, transcendentals=transcendentals,
                           bytes_accessed=bytes_accessed)
    params = pltpu.CompilerParams(
        dimension_semantics=("parallel",),                     # shard steps across TCs
        vmem_limit_bytes=int(min(vmem_cap * 0.9,
                                 max(32 * 2 ** 20, 2 * vmem_estimate(tb)))))

    in_specs = [
        pl.BlockSpec((tb, s, e), lambda i: (i, 0, 0)),         # x tile (tb windows)
        full_spec(w_qkv_m.shape), full_spec(b_qkv.shape),      # fused QKV weight/bias
        full_spec(pos_bias.shape),                             # (H, s, s) resident
        full_spec(wproj_m.shape), full_spec(bproj.shape),      # output projection
    ]
    scratch = [pltpu.VMEM((tb * s, hd), jnp.float32)]          # per-step head gather

    def run(pack_output):
        if pack_output:    # lane-dense output tile: last dim = s*e >= 128 lanes
            out_shape = jax.ShapeDtypeStruct((n_blocks, tb, s * e), x.dtype)
            out_spec = pl.BlockSpec((1, tb, s * e), lambda i: (i, 0, 0))
        else:              # known-good fallback layout (masked 32-lane stores)
            out_shape = jax.ShapeDtypeStruct((n_blocks, tb, s, e), x.dtype)
            out_spec = pl.BlockSpec((1, tb, s, e), lambda i: (i, 0, 0, 0))
        out = pl.pallas_call(
            kernel,
            out_shape=out_shape,
            grid=(n_blocks,),
            in_specs=in_specs,
            out_specs=out_spec,
            scratch_shapes=scratch,
            compiler_params=params,
            cost_estimate=cost,
        )(xf, w_qkv_m, b_qkv, pos_bias, wproj_m, bproj)
        return jax.block_until_ready(out).reshape(B_pad, s, e)

    try:
        out = run(pack_output=True)
    except Exception:
        # TODO(synk): if the minor-dim-merging (m, e) -> (tb, s*e) reshape is not
        #   supported by the installed Mosaic, fall back to the (tb, s, e) layout.
        out = run(pack_output=False)

    return out[:B].reshape(b, w, s, e)


def attention_ref(x, wq, bq, wk, bk, wv, bv, pos_bias, wproj, bproj,
                  *, num_head, dim_head):
    """Pure-JAX reference mirroring the PyTorch forward (eval mode, mask=None)."""
    b, w, s, e = x.shape
    scale = dim_head ** (-0.5)
    q = (x @ wq + bq[0]) * scale
    k = x @ wk + bk[0]
    v = x @ wv + bv[0]

    def split(t):
        return t.reshape(b, w, s, num_head, dim_head).transpose(0, 1, 3, 2, 4)

    q, k, v = split(q), split(k), split(v)
    att = q @ jnp.swapaxes(k, -2, -1) + pos_bias               # broadcast (h, s, s)
    att = jax.nn.softmax(att, axis=-1)
    z = att @ v
    z = jnp.swapaxes(z, 2, 3).reshape(b, w, s, num_head * dim_head)
    return z @ wproj + bproj[0]


if __name__ == "__main__":
    # Small shapes consistent with the module's forward.
    b, w, s = 2, 2, 8
    num_head, dim_head = 4, 8
    dim_embedding = 32
    hd = num_head * dim_head

    key = jax.random.PRNGKey(0)
    keys = jax.random.split(key, 10)

    x = jax.random.normal(keys[0], (b, w, s, dim_embedding), dtype=jnp.float32)

    # Deterministic synthetic parameters (Linear weights stored as (in, out)).
    init = lambda k, shape: (0.05 * jax.random.normal(k, shape)).astype(jnp.float32)
    wq = init(keys[1], (dim_embedding, hd)); bq = init(keys[2], (1, hd))
    wk = init(keys[3], (dim_embedding, hd)); bk = init(keys[4], (1, hd))
    wv = init(keys[5], (dim_embedding, hd)); bv = init(keys[6], (1, hd))
    wproj = init(keys[7], (hd, dim_embedding)); bproj = init(keys[8], (1, dim_embedding))
    pos_bias = init(keys[9], (num_head, s, s))

    out = attention_forward(x, wq, bq, wk, bk, wv, bv, pos_bias, wproj, bproj,
                            num_head=num_head, dim_head=dim_head)
    out = jax.block_until_ready(out)

    ref = attention_ref(x, wq, bq, wk, bk, wv, bv, pos_bias, wproj, bproj,
                        num_head=num_head, dim_head=dim_head)
    assert out.shape == (b, w, s, dim_embedding)
    # Tolerance accounts for the EUP approximate reciprocal in the softmax.
    assert jnp.allclose(out, ref, atol=2e-3, rtol=2e-3), "mismatch vs reference"
    print("KERNEL_OK")
</pallas_src>

<mosaic_0001>
module attributes {stable_mosaic.version = 11 : i64} {
  func.func @attention_kernel(%arg0: i32, %arg1: memref<1x8x32xf32, #tpu.memory_space<vmem>>, %arg2: memref<32x96xf32, #tpu.memory_space<vmem>>, %arg3: memref<1x96xf32, #tpu.memory_space<vmem>>, %arg4: memref<4x8x8xf32, #tpu.memory_space<vmem>>, %arg5: memref<32x32xf32, #tpu.memory_space<vmem>>, %arg6: memref<1x32xf32, #tpu.memory_space<vmem>>, %arg7: memref<1x1x256xf32, #tpu.memory_space<vmem>>, %arg8: memref<8x32xf32, #tpu.memory_space<vmem>>) attributes {dimension_semantics = [#tpu.dimension_semantics<parallel>], iteration_bounds = array<i64: 4>, scalar_prefetch = 0 : i64, scratch_operands = 1 : i64, tpu.core_type = #tpu.core_type<tc>, window_params = [{transform_indices = @transform_0, window_bounds = array<i64: 1, 8, 32>}, {pipeline_mode = #tpu.pipeline_mode<synchronous>, transform_indices = @transform_1, window_bounds = array<i64: 32, 96>}, {pipeline_mode = #tpu.pipeline_mode<synchronous>, transform_indices = @transform_2, window_bounds = array<i64: 1, 96>}, {pipeline_mode = #tpu.pipeline_mode<synchronous>, transform_indices = @transform_3, window_bounds = array<i64: 4, 8, 8>}, {pipeline_mode = #tpu.pipeline_mode<synchronous>, transform_indices = @transform_4, window_bounds = array<i64: 32, 32>}, {pipeline_mode = #tpu.pipeline_mode<synchronous>, transform_indices = @transform_5, window_bounds = array<i64: 1, 32>}, {transform_indices = @transform_6, window_bounds = array<i64: 1, 1, 256>}]} {
    %c0 = arith.constant 0 : index
    %c0_0 = arith.constant 0 : index
    %c0_1 = arith.constant 0 : index
    %0 = vector.load %arg1[%c0, %c0_0, %c0_1] : memref<1x8x32xf32, #tpu.memory_space<vmem>>, vector<1x8x32xf32>
    %1 = vector.shape_cast %0 : vector<1x8x32xf32> to vector<8x32xf32>
    %c0_2 = arith.constant 0 : index
    %c0_3 = arith.constant 0 : index
    %2 = vector.load %arg2[%c0_2, %c0_3] : memref<32x96xf32, #tpu.memory_space<vmem>>, vector<32x96xf32>
    %cst = arith.constant dense<0.000000e+00> : vector<8x96xf32>
    %3 = tpu.matmul %1, %2, %cst {dimension_numbers = #tpu.dot_dimension_numbers<[1], [0], [0], [1], [0, 0, 1, 1], [], []>} : vector<8x32xf32>, vector<32x96xf32>, vector<8x96xf32> -> vector<8x96xf32>
    %c0_4 = arith.constant 0 : index
    %c0_5 = arith.constant 0 : index
    %4 = vector.load %arg3[%c0_4, %c0_5] : memref<1x96xf32, #tpu.memory_space<vmem>>, vector<1x96xf32>
    %5 = vector.shape_cast %4 : vector<1x96xf32> to vector<96xf32>
    %6 = vector.shape_cast %5 : vector<96xf32> to vector<1x96xf32>
    %7 = vector.broadcast %6 : vector<1x96xf32> to vector<8x96xf32>
    %8 = arith.addf %3, %7 : vector<8x96xf32>
    %9 = vector.extract_strided_slice %8 {offsets = [0, 0], sizes = [8, 8], strides = [1, 1]} : vector<8x96xf32> to vector<8x8xf32>
    %10 = vector.shape_cast %9 : vector<8x8xf32> to vector<1x8x8xf32>
    %11 = vector.extract_strided_slice %8 {offsets = [0, 32], sizes = [8, 8], strides = [1, 1]} : vector<8x96xf32> to vector<8x8xf32>
    %12 = vector.shape_cast %11 : vector<8x8xf32> to vector<1x8x8xf32>
    %13 = vector.extract_strided_slice %8 {offsets = [0, 64], sizes = [8, 8], strides = [1, 1]} : vector<8x96xf32> to vector<8x8xf32>
    %14 = vector.shape_cast %13 : vector<8x8xf32> to vector<1x8x8xf32>
    "tpu.trace_start"() <{level = 10 : i32, message = "bqd,bkd->bqk"}> : () -> ()
    %cst_6 = arith.constant dense<0.000000e+00> : vector<1x8x8xf32>
    %15 = tpu.matmul %10, %12, %cst_6 {dimension_numbers = #tpu.dot_dimension_numbers<[2], [2], [1], [1], [0, 0, 0, 1, 1, 1], [0], [0]>} : vector<1x8x8xf32>, vector<1x8x8xf32>, vector<1x8x8xf32> -> vector<1x8x8xf32>
    "tpu.trace_stop"() : () -> ()
    %c0_7 = arith.constant 0 : index
    %c0_8 = arith.constant 0 : index
    %c0_9 = arith.constant 0 : index
    %16 = vector.load %arg4[%c0_7, %c0_8, %c0_9] : memref<4x8x8xf32, #tpu.memory_space<vmem>>, vector<1x8x8xf32>
    %17 = vector.shape_cast %16 : vector<1x8x8xf32> to vector<8x8xf32>
    %18 = vector.shape_cast %17 : vector<8x8xf32> to vector<1x8x8xf32>
    %19 = arith.addf %15, %18 : vector<1x8x8xf32>
    %cst_10 = arith.constant dense<0xFF800000> : vector<1x8xf32>
    %20 = vector.multi_reduction <maximumf>, %19, %cst_10 [2] : vector<1x8x8xf32> to vector<1x8xf32>
    %21 = vector.shape_cast %20 : vector<1x8xf32> to vector<1x8x1xf32>
    %22 = vector.broadcast %21 : vector<1x8x1xf32> to vector<1x8x8xf32>
    %23 = arith.subf %19, %22 : vector<1x8x8xf32>
    %24 = math.exp %23 : vector<1x8x8xf32>
    %cst_11 = arith.constant dense<0.000000e+00> : vector<1x8xf32>
    %25 = vector.multi_reduction <add>, %24, %cst_11 [2] : vector<1x8x8xf32> to vector<1x8xf32>
    %26 = vector.shape_cast %25 : vector<1x8xf32> to vector<1x8x1xf32>
    %27 = tpu.reciprocal %26 {approx = true} : vector<1x8x1xf32> -> vector<1x8x1xf32>
    %28 = vector.broadcast %27 : vector<1x8x1xf32> to vector<1x8x8xf32>
    %29 = arith.mulf %24, %28 : vector<1x8x8xf32>
    "tpu.trace_start"() <{level = 10 : i32, message = "bqk,bkd->bqd"}> : () -> ()
    %cst_12 = arith.constant dense<0.000000e+00> : vector<1x8x8xf32>
    %30 = tpu.matmul %29, %14, %cst_12 {dimension_numbers = #tpu.dot_dimension_numbers<[2], [1], [1], [2], [0, 0, 0, 1, 1, 2], [0], [0]>} : vector<1x8x8xf32>, vector<1x8x8xf32>, vector<1x8x8xf32> -> vector<1x8x8xf32>
    "tpu.trace_stop"() : () -> ()
    %31 = vector.shape_cast %30 : vector<1x8x8xf32> to vector<8x8xf32>
    %c0_13 = arith.constant 0 : index
    %c0_14 = arith.constant 0 : index
    %32 = vector.load %arg8[%c0_13, %c0_14] : memref<8x32xf32, #tpu.memory_space<vmem>>, vector<8x8xf32>
    tpu.vector_store %arg8[%c0_13, %c0_14], %31 {strides = array<i32>} : memref<8x32xf32, #tpu.memory_space<vmem>>, vector<8x8xf32>,
    %33 = vector.extract_strided_slice %8 {offsets = [0, 8], sizes = [8, 8], strides = [1, 1]} : vector<8x96xf32> to vector<8x8xf32>
    %34 = vector.shape_cast %33 : vector<8x8xf32> to vector<1x8x8xf32>
    %35 = vector.extract_strided_slice %8 {offsets = [0, 40], sizes = [8, 8], strides = [1, 1]} : vector<8x96xf32> to vector<8x8xf32>
    %36 = vector.shape_cast %35 : vector<8x8xf32> to vector<1x8x8xf32>
    %37 = vector.extract_strided_slice %8 {offsets = [0, 72], sizes = [8, 8], strides = [1, 1]} : vector<8x96xf32> to vector<8x8xf32>
    %38 = vector.shape_cast %37 : vector<8x8xf32> to vector<1x8x8xf32>
    "tpu.trace_start"() <{level = 10 : i32, message = "bqd,bkd->bqk"}> : () -> ()
    %cst_15 = arith.constant dense<0.000000e+00> : vector<1x8x8xf32>
    %39 = tpu.matmul %34, %36, %cst_15 {dimension_numbers = #tpu.dot_dimension_numbers<[2], [2], [1], [1], [0, 0, 0, 1, 1, 1], [0], [0]>} : vector<1x8x8xf32>, vector<1x8x8xf32>, vector<1x8x8xf32> -> vector<1x8x8xf32>
    "tpu.trace_stop"() : () -> ()
    %c1 = arith.constant 1 : index
    %c0_16 = arith.constant 0 : index
    %c0_17 = arith.constant 0 : index
    %40 = vector.load %arg4[%c1, %c0_16, %c0_17] : memref<4x8x8xf32, #tpu.memory_space<vmem>>, vector<1x8x8xf32>
    %41 = vector.shape_cast %40 : vector<1x8x8xf32> to vector<8x8xf32>
    %42 = vector.shape_cast %41 : vector<8x8xf32> to vector<1x8x8xf32>
    %43 = arith.addf %39, %42 : vector<1x8x8xf32>
    %cst_18 = arith.constant dense<0xFF800000> : vector<1x8xf32>
    %44 = vector.multi_reduction <maximumf>, %43, %cst_18 [2] : vector<1x8x8xf32> to vector<1x8xf32>
    %45 = vector.shape_cast %44 : vector<1x8xf32> to vector<1x8x1xf32>
    %46 = vector.broadcast %45 : vector<1x8x1xf32> to vector<1x8x8xf32>
    %47 = arith.subf %43, %46 : vector<1x8x8xf32>
    %48 = math.exp %47 : vector<1x8x8xf32>
    %cst_19 = arith.constant dense<0.000000e+00> : vector<1x8xf32>
    %49 = vector.multi_reduction <add>, %48, %cst_19 [2] : vector<1x8x8xf32> to vector<1x8xf32>
    %50 = vector.shape_cast %49 : vector<1x8xf32> to vector<1x8x1xf32>
    %51 = tpu.reciprocal %50 {approx = true} : vector<1x8x1xf32> -> vector<1x8x1xf32>
    %52 = vector.broadcast %51 : vector<1x8x1xf32> to vector<1x8x8xf32>
    %53 = arith.mulf %48, %52 : vector<1x8x8xf32>
    "tpu.trace_start"() <{level = 10 : i32, message = "bqk,bkd->bqd"}> : () -> ()
    %cst_20 = arith.constant dense<0.000000e+00> : vector<1x8x8xf32>
    %54 = tpu.matmul %53, %38, %cst_20 {dimension_numbers = #tpu.dot_dimension_numbers<[2], [1], [1], [2], [0, 0, 0, 1, 1, 2], [0], [0]>} : vector<1x8x8xf32>, vector<1x8x8xf32>, vector<1x8x8xf32> -> vector<1x8x8xf32>
    "tpu.trace_stop"() : () -> ()
    %55 = vector.shape_cast %54 : vector<1x8x8xf32> to vector<8x8xf32>
    %c0_21 = arith.constant 0 : index
    %c8 = arith.constant 8 : index
    %56 = vector.load %arg8[%c0_21, %c8] : memref<8x32xf32, #tpu.memory_space<vmem>>, vector<8x8xf32>
    tpu.vector_store %arg8[%c0_21, %c8], %55 {strides = array<i32>} : memref<8x32xf32, #tpu.memory_space<vmem>>, vector<8x8xf32>,
    %57 = vector.extract_strided_slice %8 {offsets = [0, 16], sizes = [8, 8], strides = [1, 1]} : vector<8x96xf32> to vector<8x8xf32>
    %58 = vector.shape_cast %57 : vector<8x8xf32> to vector<1x8x8xf32>
    %59 = vector.extract_strided_slice %8 {offsets = [0, 48], sizes = [8, 8], strides = [1, 1]} : vector<8x96xf32> to vector<8x8xf32>
    %60 = vector.shape_cast %59 : vector<8x8xf32> to vector<1x8x8xf32>
    %61 = vector.extract_strided_slice %8 {offsets = [0, 80], sizes = [8, 8], strides = [1, 1]} : vector<8x96xf32> to vector<8x8xf32>
    %62 = vector.shape_cast %61 : vector<8x8xf32> to vector<1x8x8xf32>
    "tpu.trace_start"() <{level = 10 : i32, message = "bqd,bkd->bqk"}> : () -> ()
    %cst_22 = arith.constant dense<0.000000e+00> : vector<1x8x8xf32>
    %63 = tpu.matmul %58, %60, %cst_22 {dimension_numbers = #tpu.dot_dimension_numbers<[2], [2], [1], [1], [0, 0, 0, 1, 1, 1], [0], [0]>} : vector<1x8x8xf32>, vector<1x8x8xf32>, vector<1x8x8xf32> -> vector<1x8x8xf32>
    "tpu.trace_stop"() : () -> ()
    %c2 = arith.constant 2 : index
    %c0_23 = arith.constant 0 : index
    %c0_24 = arith.constant 0 : index
    %64 = vector.load %arg4[%c2, %c0_23, %c0_24] : memref<4x8x8xf32, #tpu.memory_space<vmem>>, vector<1x8x8xf32>
    %65 = vector.shape_cast %64 : vector<1x8x8xf32> to vector<8x8xf32>
    %66 = vector.shape_cast %65 : vector<8x8xf32> to vector<1x8x8xf32>
    %67 = arith.addf %63, %66 : vector<1x8x8xf32>
    %cst_25 = arith.constant dense<0xFF800000> : vector<1x8xf32>
    %68 = vector.multi_reduction <maximumf>, %67, %cst_25 [2] : vector<1x8x8xf32> to vector<1x8xf32>
    %69 = vector.shape_cast %68 : vector<1x8xf32> to vector<1x8x1xf32>
    %70 = vector.broadcast %69 : vector<1x8x1xf32> to vector<1x8x8xf32>
    %71 = arith.subf %67, %70 : vector<1x8x8xf32>
    %72 = math.exp %71 : vector<1x8x8xf32>
    %cst_26 = arith.constant dense<0.000000e+00> : vector<1x8xf32>
    %73 = vector.multi_reduction <add>, %72, %cst_26 [2] : vector<1x8x8xf32> to vector<1x8xf32>
    %74 = vector.shape_cast %73 : vector<1x8xf32> to vector<1x8x1xf32>
    %75 = tpu.reciprocal %74 {approx = true} : vector<1x8x1xf32> -> vector<1x8x1xf32>
    %76 = vector.broadcast %75 : vector<1x8x1xf32> to vector<1x8x8xf32>
    %77 = arith.mulf %72, %76 : vector<1x8x8xf32>
    "tpu.trace_start"() <{level = 10 : i32, message = "bqk,bkd->bqd"}> : () -> ()
    %cst_27 = arith.constant dense<0.000000e+00> : vector<1x8x8xf32>
    %78 = tpu.matmul %77, %62, %cst_27 {dimension_numbers = #tpu.dot_dimension_numbers<[2], [1], [1], [2], [0, 0, 0, 1, 1, 2], [0], [0]>} : vector<1x8x8xf32>, vector<1x8x8xf32>, vector<1x8x8xf32> -> vector<1x8x8xf32>
    "tpu.trace_stop"() : () -> ()
    %79 = vector.shape_cast %78 : vector<1x8x8xf32> to vector<8x8xf32>
    %c0_28 = arith.constant 0 : index
    %c16 = arith.constant 16 : index
    %80 = vector.load %arg8[%c0_28, %c16] : memref<8x32xf32, #tpu.memory_space<vmem>>, vector<8x8xf32>
    tpu.vector_store %arg8[%c0_28, %c16], %79 {strides = array<i32>} : memref<8x32xf32, #tpu.memory_space<vmem>>, vector<8x8xf32>,
    %81 = vector.extract_strided_slice %8 {offsets = [0, 24], sizes = [8, 8], strides = [1, 1]} : vector<8x96xf32> to vector<8x8xf32>
    %82 = vector.shape_cast %81 : vector<8x8xf32> to vector<1x8x8xf32>
    %83 = vector.extract_strided_slice %8 {offsets = [0, 56], sizes = [8, 8], strides = [1, 1]} : vector<8x96xf32> to vector<8x8xf32>
    %84 = vector.shape_cast %83 : vector<8x8xf32> to vector<1x8x8xf32>
    %85 = vector.extract_strided_slice %8 {offsets = [0, 88], sizes = [8, 8], strides = [1, 1]} : vector<8x96xf32> to vector<8x8xf32>
    %86 = vector.shape_cast %85 : vector<8x8xf32> to vector<1x8x8xf32>
    "tpu.trace_start"() <{level = 10 : i32, message = "bqd,bkd->bqk"}> : () -> ()
    %cst_29 = arith.constant dense<0.000000e+00> : vector<1x8x8xf32>
    %87 = tpu.matmul %82, %84, %cst_29 {dimension_numbers = #tpu.dot_dimension_numbers<[2], [2], [1], [1], [0, 0, 0, 1, 1, 1], [0], [0]>} : vector<1x8x8xf32>, vector<1x8x8xf32>, vector<1x8x8xf32> -> vector<1x8x8xf32>
    "tpu.trace_stop"() : () -> ()
    %c3 = arith.constant 3 : index
    %c0_30 = arith.constant 0 : index
    %c0_31 = arith.constant 0 : index
    %88 = vector.load %arg4[%c3, %c0_30, %c0_31] : memref<4x8x8xf32, #tpu.memory_space<vmem>>, vector<1x8x8xf32>
    %89 = vector.shape_cast %88 : vector<1x8x8xf32> to vector<8x8xf32>
    %90 = vector.shape_cast %89 : vector<8x8xf32> to vector<1x8x8xf32>
    %91 = arith.addf %87, %90 : vector<1x8x8xf32>
    %cst_32 = arith.constant dense<0xFF800000> : vector<1x8xf32>
    %92 = vector.multi_reduction <maximumf>, %91, %cst_32 [2] : vector<1x8x8xf32> to vector<1x8xf32>
    %93 = vector.shape_cast %92 : vector<1x8xf32> to vector<1x8x1xf32>
    %94 = vector.broadcast %93 : vector<1x8x1xf32> to vector<1x8x8xf32>
    %95 = arith.subf %91, %94 : vector<1x8x8xf32>
    %96 = math.exp %95 : vector<1x8x8xf32>
    %cst_33 = arith.constant dense<0.000000e+00> : vector<1x8xf32>
    %97 = vector.multi_reduction <add>, %96, %cst_33 [2] : vector<1x8x8xf32> to vector<1x8xf32>
    %98 = vector.shape_cast %97 : vector<1x8xf32> to vector<1x8x1xf32>
    %99 = tpu.reciprocal %98 {approx = true} : vector<1x8x1xf32> -> vector<1x8x1xf32>
    %100 = vector.broadcast %99 : vector<1x8x1xf32> to vector<1x8x8xf32>
    %101 = arith.mulf %96, %100 : vector<1x8x8xf32>
    "tpu.trace_start"() <{level = 10 : i32, message = "bqk,bkd->bqd"}> : () -> ()
    %cst_34 = arith.constant dense<0.000000e+00> : vector<1x8x8xf32>
    %102 = tpu.matmul %101, %86, %cst_34 {dimension_numbers = #tpu.dot_dimension_numbers<[2], [1], [1], [2], [0, 0, 0, 1, 1, 2], [0], [0]>} : vector<1x8x8xf32>, vector<1x8x8xf32>, vector<1x8x8xf32> -> vector<1x8x8xf32>
    "tpu.trace_stop"() : () -> ()
    %103 = vector.shape_cast %102 : vector<1x8x8xf32> to vector<8x8xf32>
    %c0_35 = arith.constant 0 : index
    %c24 = arith.constant 24 : index
    %104 = vector.load %arg8[%c0_35, %c24] : memref<8x32xf32, #tpu.memory_space<vmem>>, vector<8x8xf32>
    tpu.vector_store %arg8[%c0_35, %c24], %103 {strides = array<i32>} : memref<8x32xf32, #tpu.memory_space<vmem>>, vector<8x8xf32>,
    %c0_36 = arith.constant 0 : index
    %c0_37 = arith.constant 0 : index
    %105 = vector.load %arg8[%c0_36, %c0_37] : memref<8x32xf32, #tpu.memory_space<vmem>>, vector<8x32xf32>
    %c0_38 = arith.constant 0 : index
    %c0_39 = arith.constant 0 : index
    %106 = vector.load %arg5[%c0_38, %c0_39] : memref<32x32xf32, #tpu.memory_space<vmem>>, vector<32x32xf32>
    %cst_40 = arith.constant dense<0.000000e+00> : vector<8x32xf32>
    %107 = tpu.matmul %105, %106, %cst_40 {dimension_numbers = #tpu.dot_dimension_numbers<[1], [0], [0], [1], [0, 0, 1, 1], [], []>} : vector<8x32xf32>, vector<32x32xf32>, vector<8x32xf32> -> vector<8x32xf32>
    %c0_41 = arith.constant 0 : index
    %c0_42 = arith.constant 0 : index
    %108 = vector.load %arg6[%c0_41, %c0_42] : memref<1x32xf32, #tpu.memory_space<vmem>>, vector<1x32xf32>
    %109 = vector.shape_cast %108 : vector<1x32xf32> to vector<32xf32>
    %110 = vector.shape_cast %109 : vector<32xf32> to vector<1x32xf32>
    %111 = vector.broadcast %110 : vector<1x32xf32> to vector<8x32xf32>
    %112 = arith.addf %107, %111 : vector<8x32xf32>
    %113 = vector.shape_cast %112 : vector<8x32xf32> to vector<1x1x256xf32>
    %c0_43 = arith.constant 0 : index
    %c0_44 = arith.constant 0 : index
    %c0_45 = arith.constant 0 : index
    %114 = vector.load %arg7[%c0_43, %c0_44, %c0_45] : memref<1x1x256xf32, #tpu.memory_space<vmem>>, vector<1x1x256xf32>
    tpu.vector_store %arg7[%c0_43, %c0_44, %c0_45], %113 {strides = array<i32>} : memref<1x1x256xf32, #tpu.memory_space<vmem>>, vector<1x1x256xf32>,
    return
  }
  func.func @transform_0(%arg0: i32) -> (i32, i32, i32) {
    %c0_i32 = arith.constant 0 : i32
    %c0_i32_0 = arith.constant 0 : i32
    %c0_i32_1 = arith.constant 0 : i32
    return %arg0, %c0_i32, %c0_i32_0 : i32, i32, i32
  }
  func.func @transform_1(%arg0: i32) -> (i32, i32) {
    %c0_i32 = arith.constant 0 : i32
    %c0_i32_0 = arith.constant 0 : i32
    %c0_i32_1 = arith.constant 0 : i32
    return %c0_i32, %c0_i32_0 : i32, i32
  }
  func.func @transform_2(%arg0: i32) -> (i32, i32) {
    %c0_i32 = arith.constant 0 : i32
    %c0_i32_0 = arith.constant 0 : i32
    %c0_i32_1 = arith.constant 0 : i32
    return %c0_i32, %c0_i32_0 : i32, i32
  }
  func.func @transform_3(%arg0: i32) -> (i32, i32, i32) {
    %c0_i32 = arith.constant 0 : i32
    %c0_i32_0 = arith.constant 0 : i32
    %c0_i32_1 = arith.constant 0 : i32
    %c0_i32_2 = arith.constant 0 : i32
    return %c0_i32, %c0_i32_0, %c0_i32_1 : i32, i32, i32
  }
  func.func @transform_4(%arg0: i32) -> (i32, i32) {
    %c0_i32 = arith.constant 0 : i32
    %c0_i32_0 = arith.constant 0 : i32
    %c0_i32_1 = arith.constant 0 : i32
    return %c0_i32, %c0_i32_0 : i32, i32
  }
  func.func @transform_5(%arg0: i32) -> (i32, i32) {
    %c0_i32 = arith.constant 0 : i32
    %c0_i32_0 = arith.constant 0 : i32
    %c0_i32_1 = arith.constant 0 : i32
    return %c0_i32, %c0_i32_0 : i32, i32
  }
  func.func @transform_6(%arg0: i32) -> (i32, i32, i32) {
    %c0_i32 = arith.constant 0 : i32
    %c0_i32_0 = arith.constant 0 : i32
    %c0_i32_1 = arith.constant 0 : i32
    return %arg0, %c0_i32, %c0_i32_0 : i32, i32, i32
  }
}

module attributes {stable_mosaic.version = 11 : i64} {
  func.func @attention_kernel(%arg0: i32, %arg1: memref<1x8x32xf32, #tpu.memory_space<vmem>>, %arg2: memref<32x96xf32, #tpu.memory_space<vmem>>, %arg3: memref<1x96xf32, #tpu.memory_space<vmem>>, %arg4: memref<4x8x8xf32, #tpu.memory_space<vmem>>, %arg5: memref<32x32xf32, #tpu.memory_space<vmem>>, %arg6: memref<1x32xf32, #tpu.memory_space<vmem>>, %arg7: memref<1x1x8x32xf32, #tpu.memory_space<vmem>>, %arg8: memref<8x32xf32, #tpu.memory_space<vmem>>) attributes {dimension_semantics = [#tpu.dimension_semantics<parallel>], iteration_bounds = array<i64: 4>, scalar_prefetch = 0 : i64, scratch_operands = 1 : i64, tpu.core_type = #tpu.core_type<tc>, window_params = [{transform_indices = @transform_0, window_bounds = array<i64: 1, 8, 32>}, {pipeline_mode = #tpu.pipeline_mode<synchronous>, transform_indices = @transform_1, window_bounds = array<i64: 32, 96>}, {pipeline_mode = #tpu.pipeline_mode<synchronous>, transform_indices = @transform_2, window_bounds = array<i64: 1, 96>}, {pipeline_mode = #tpu.pipeline_mode<synchronous>, transform_indices = @transform_3, window_bounds = array<i64: 4, 8, 8>}, {pipeline_mode = #tpu.pipeline_mode<synchronous>, transform_indices = @transform_4, window_bounds = array<i64: 32, 32>}, {pipeline_mode = #tpu.pipeline_mode<synchronous>, transform_indices = @transform_5, window_bounds = array<i64: 1, 32>}, {transform_indices = @transform_6, window_bounds = array<i64: 1, 1, 8, 32>}]} {
    %c0 = arith.constant 0 : index
    %c0_0 = arith.constant 0 : index
    %c0_1 = arith.constant 0 : index
    %0 = vector.load %arg1[%c0, %c0_0, %c0_1] : memref<1x8x32xf32, #tpu.memory_space<vmem>>, vector<1x8x32xf32>
    %1 = vector.shape_cast %0 : vector<1x8x32xf32> to vector<8x32xf32>
    %c0_2 = arith.constant 0 : index
    %c0_3 = arith.constant 0 : index
    %2 = vector.load %arg2[%c0_2, %c0_3] : memref<32x96xf32, #tpu.memory_space<vmem>>, vector<32x96xf32>
    %cst = arith.constant dense<0.000000e+00> : vector<8x96xf32>
    %3 = tpu.matmul %1, %2, %cst {dimension_numbers = #tpu.dot_dimension_numbers<[1], [0], [0], [1], [0, 0, 1, 1], [], []>} : vector<8x32xf32>, vector<32x96xf32>, vector<8x96xf32> -> vector<8x96xf32>
    %c0_4 = arith.constant 0 : index
    %c0_5 = arith.constant 0 : index
    %4 = vector.load %arg3[%c0_4, %c0_5] : memref<1x96xf32, #tpu.memory_space<vmem>>, vector<1x96xf32>
    %5 = vector.shape_cast %4 : vector<1x96xf32> to vector<96xf32>
    %6 = vector.shape_cast %5 : vector<96xf32> to vector<1x96xf32>
    %7 = vector.broadcast %6 : vector<1x96xf32> to vector<8x96xf32>
    %8 = arith.addf %3, %7 : vector<8x96xf32>
    %9 = vector.extract_strided_slice %8 {offsets = [0, 0], sizes = [8, 8], strides = [1, 1]} : vector<8x96xf32> to vector<8x8xf32>
    %10 = vector.shape_cast %9 : vector<8x8xf32> to vector<1x8x8xf32>
    %11 = vector.extract_strided_slice %8 {offsets = [0, 32], sizes = [8, 8], strides = [1, 1]} : vector<8x96xf32> to vector<8x8xf32>
    %12 = vector.shape_cast %11 : vector<8x8xf32> to vector<1x8x8xf32>
    %13 = vector.extract_strided_slice %8 {offsets = [0, 64], sizes = [8, 8], strides = [1, 1]} : vector<8x96xf32> to vector<8x8xf32>
    %14 = vector.shape_cast %13 : vector<8x8xf32> to vector<1x8x8xf32>
    "tpu.trace_start"() <{level = 10 : i32, message = "bqd,bkd->bqk"}> : () -> ()
    %cst_6 = arith.constant dense<0.000000e+00> : vector<1x8x8xf32>
    %15 = tpu.matmul %10, %12, %cst_6 {dimension_numbers = #tpu.dot_dimension_numbers<[2], [2], [1], [1], [0, 0, 0, 1, 1, 1], [0], [0]>} : vector<1x8x8xf32>, vector<1x8x8xf32>, vector<1x8x8xf32> -> vector<1x8x8xf32>
    "tpu.trace_stop"() : () -> ()
    %c0_7 = arith.constant 0 : index
    %c0_8 = arith.constant 0 : index
    %c0_9 = arith.constant 0 : index
    %16 = vector.load %arg4[%c0_7, %c0_8, %c0_9] : memref<4x8x8xf32, #tpu.memory_space<vmem>>, vector<1x8x8xf32>
    %17 = vector.shape_cast %16 : vector<1x8x8xf32> to vector<8x8xf32>
    %18 = vector.shape_cast %17 : vector<8x8xf32> to vector<1x8x8xf32>
    %19 = arith.addf %15, %18 : vector<1x8x8xf32>
    %cst_10 = arith.constant dense<0xFF800000> : vector<1x8xf32>
    %20 = vector.multi_reduction <maximumf>, %19, %cst_10 [2] : vector<1x8x8xf32> to vector<1x8xf32>
    %21 = vector.shape_cast %20 : vector<1x8xf32> to vector<1x8x1xf32>
    %22 = vector.broadcast %21 : vector<1x8x1xf32> to vector<1x8x8xf32>
    %23 = arith.subf %19, %22 : vector<1x8x8xf32>
    %24 = math.exp %23 : vector<1x8x8xf32>
    %cst_11 = arith.constant dense<0.000000e+00> : vector<1x8xf32>
    %25 = vector.multi_reduction <add>, %24, %cst_11 [2] : vector<1x8x8xf32> to vector<1x8xf32>
    %26 = vector.shape_cast %25 : vector<1x8xf32> to vector<1x8x1xf32>
    %27 = tpu.reciprocal %26 {approx = true} : vector<1x8x1xf32> -> vector<1x8x1xf32>
    %28 = vector.broadcast %27 : vector<1x8x1xf32> to vector<1x8x8xf32>
    %29 = arith.mulf %24, %28 : vector<1x8x8xf32>
    "tpu.trace_start"() <{level = 10 : i32, message = "bqk,bkd->bqd"}> : () -> ()
    %cst_12 = arith.constant dense<0.000000e+00> : vector<1x8x8xf32>
    %30 = tpu.matmul %29, %14, %cst_12 {dimension_numbers = #tpu.dot_dimension_numbers<[2], [1], [1], [2], [0, 0, 0, 1, 1, 2], [0], [0]>} : vector<1x8x8xf32>, vector<1x8x8xf32>, vector<1x8x8xf32> -> vector<1x8x8xf32>
    "tpu.trace_stop"() : () -> ()
    %31 = vector.shape_cast %30 : vector<1x8x8xf32> to vector<8x8xf32>
    %c0_13 = arith.constant 0 : index
    %c0_14 = arith.constant 0 : index
    %32 = vector.load %arg8[%c0_13, %c0_14] : memref<8x32xf32, #tpu.memory_space<vmem>>, vector<8x8xf32>
    tpu.vector_store %arg8[%c0_13, %c0_14], %31 {strides = array<i32>} : memref<8x32xf32, #tpu.memory_space<vmem>>, vector<8x8xf32>,
    %33 = vector.extract_strided_slice %8 {offsets = [0, 8], sizes = [8, 8], strides = [1, 1]} : vector<8x96xf32> to vector<8x8xf32>
    %34 = vector.shape_cast %33 : vector<8x8xf32> to vector<1x8x8xf32>
    %35 = vector.extract_strided_slice %8 {offsets = [0, 40], sizes = [8, 8], strides = [1, 1]} : vector<8x96xf32> to vector<8x8xf32>
    %36 = vector.shape_cast %35 : vector<8x8xf32> to vector<1x8x8xf32>
    %37 = vector.extract_strided_slice %8 {offsets = [0, 72], sizes = [8, 8], strides = [1, 1]} : vector<8x96xf32> to vector<8x8xf32>
    %38 = vector.shape_cast %37 : vector<8x8xf32> to vector<1x8x8xf32>
    "tpu.trace_start"() <{level = 10 : i32, message = "bqd,bkd->bqk"}> : () -> ()
    %cst_15 = arith.constant dense<0.000000e+00> : vector<1x8x8xf32>
    %39 = tpu.matmul %34, %36, %cst_15 {dimension_numbers = #tpu.dot_dimension_numbers<[2], [2], [1], [1], [0, 0, 0, 1, 1, 1], [0], [0]>} : vector<1x8x8xf32>, vector<1x8x8xf32>, vector<1x8x8xf32> -> vector<1x8x8xf32>
    "tpu.trace_stop"() : () -> ()
    %c1 = arith.constant 1 : index
    %c0_16 = arith.constant 0 : index
    %c0_17 = arith.constant 0 : index
    %40 = vector.load %arg4[%c1, %c0_16, %c0_17] : memref<4x8x8xf32, #tpu.memory_space<vmem>>, vector<1x8x8xf32>
    %41 = vector.shape_cast %40 : vector<1x8x8xf32> to vector<8x8xf32>
    %42 = vector.shape_cast %41 : vector<8x8xf32> to vector<1x8x8xf32>
    %43 = arith.addf %39, %42 : vector<1x8x8xf32>
    %cst_18 = arith.constant dense<0xFF800000> : vector<1x8xf32>
    %44 = vector.multi_reduction <maximumf>, %43, %cst_18 [2] : vector<1x8x8xf32> to vector<1x8xf32>
    %45 = vector.shape_cast %44 : vector<1x8xf32> to vector<1x8x1xf32>
    %46 = vector.broadcast %45 : vector<1x8x1xf32> to vector<1x8x8xf32>
    %47 = arith.subf %43, %46 : vector<1x8x8xf32>
    %48 = math.exp %47 : vector<1x8x8xf32>
    %cst_19 = arith.constant dense<0.000000e+00> : vector<1x8xf32>
    %49 = vector.multi_reduction <add>, %48, %cst_19 [2] : vector<1x8x8xf32> to vector<1x8xf32>
    %50 = vector.shape_cast %49 : vector<1x8xf32> to vector<1x8x1xf32>
    %51 = tpu.reciprocal %50 {approx = true} : vector<1x8x1xf32> -> vector<1x8x1xf32>
    %52 = vector.broadcast %51 : vector<1x8x1xf32> to vector<1x8x8xf32>
    %53 = arith.mulf %48, %52 : vector<1x8x8xf32>
    "tpu.trace_start"() <{level = 10 : i32, message = "bqk,bkd->bqd"}> : () -> ()
    %cst_20 = arith.constant dense<0.000000e+00> : vector<1x8x8xf32>
    %54 = tpu.matmul %53, %38, %cst_20 {dimension_numbers = #tpu.dot_dimension_numbers<[2], [1], [1], [2], [0, 0, 0, 1, 1, 2], [0], [0]>} : vector<1x8x8xf32>, vector<1x8x8xf32>, vector<1x8x8xf32> -> vector<1x8x8xf32>
    "tpu.trace_stop"() : () -> ()
    %55 = vector.shape_cast %54 : vector<1x8x8xf32> to vector<8x8xf32>
    %c0_21 = arith.constant 0 : index
    %c8 = arith.constant 8 : index
    %56 = vector.load %arg8[%c0_21, %c8] : memref<8x32xf32, #tpu.memory_space<vmem>>, vector<8x8xf32>
    tpu.vector_store %arg8[%c0_21, %c8], %55 {strides = array<i32>} : memref<8x32xf32, #tpu.memory_space<vmem>>, vector<8x8xf32>,
    %57 = vector.extract_strided_slice %8 {offsets = [0, 16], sizes = [8, 8], strides = [1, 1]} : vector<8x96xf32> to vector<8x8xf32>
    %58 = vector.shape_cast %57 : vector<8x8xf32> to vector<1x8x8xf32>
    %59 = vector.extract_strided_slice %8 {offsets = [0, 48], sizes = [8, 8], strides = [1, 1]} : vector<8x96xf32> to vector<8x8xf32>
    %60 = vector.shape_cast %59 : vector<8x8xf32> to vector<1x8x8xf32>
    %61 = vector.extract_strided_slice %8 {offsets = [0, 80], sizes = [8, 8], strides = [1, 1]} : vector<8x96xf32> to vector<8x8xf32>
    %62 = vector.shape_cast %61 : vector<8x8xf32> to vector<1x8x8xf32>
    "tpu.trace_start"() <{level = 10 : i32, message = "bqd,bkd->bqk"}> : () -> ()
    %cst_22 = arith.constant dense<0.000000e+00> : vector<1x8x8xf32>
    %63 = tpu.matmul %58, %60, %cst_22 {dimension_numbers = #tpu.dot_dimension_numbers<[2], [2], [1], [1], [0, 0, 0, 1, 1, 1], [0], [0]>} : vector<1x8x8xf32>, vector<1x8x8xf32>, vector<1x8x8xf32> -> vector<1x8x8xf32>
    "tpu.trace_stop"() : () -> ()
    %c2 = arith.constant 2 : index
    %c0_23 = arith.constant 0 : index
    %c0_24 = arith.constant 0 : index
    %64 = vector.load %arg4[%c2, %c0_23, %c0_24] : memref<4x8x8xf32, #tpu.memory_space<vmem>>, vector<1x8x8xf32>
    %65 = vector.shape_cast %64 : vector<1x8x8xf32> to vector<8x8xf32>
    %66 = vector.shape_cast %65 : vector<8x8xf32> to vector<1x8x8xf32>
    %67 = arith.addf %63, %66 : vector<1x8x8xf32>
    %cst_25 = arith.constant dense<0xFF800000> : vector<1x8xf32>
    %68 = vector.multi_reduction <maximumf>, %67, %cst_25 [2] : vector<1x8x8xf32> to vector<1x8xf32>
    %69 = vector.shape_cast %68 : vector<1x8xf32> to vector<1x8x1xf32>
    %70 = vector.broadcast %69 : vector<1x8x1xf32> to vector<1x8x8xf32>
    %71 = arith.subf %67, %70 : vector<1x8x8xf32>
    %72 = math.exp %71 : vector<1x8x8xf32>
    %cst_26 = arith.constant dense<0.000000e+00> : vector<1x8xf32>
    %73 = vector.multi_reduction <add>, %72, %cst_26 [2] : vector<1x8x8xf32> to vector<1x8xf32>
    %74 = vector.shape_cast %73 : vector<1x8xf32> to vector<1x8x1xf32>
    %75 = tpu.reciprocal %74 {approx = true} : vector<1x8x1xf32> -> vector<1x8x1xf32>
    %76 = vector.broadcast %75 : vector<1x8x1xf32> to vector<1x8x8xf32>
    %77 = arith.mulf %72, %76 : vector<1x8x8xf32>
    "tpu.trace_start"() <{level = 10 : i32, message = "bqk,bkd->bqd"}> : () -> ()
    %cst_27 = arith.constant dense<0.000000e+00> : vector<1x8x8xf32>
    %78 = tpu.matmul %77, %62, %cst_27 {dimension_numbers = #tpu.dot_dimension_numbers<[2], [1], [1], [2], [0, 0, 0, 1, 1, 2], [0], [0]>} : vector<1x8x8xf32>, vector<1x8x8xf32>, vector<1x8x8xf32> -> vector<1x8x8xf32>
    "tpu.trace_stop"() : () -> ()
    %79 = vector.shape_cast %78 : vector<1x8x8xf32> to vector<8x8xf32>
    %c0_28 = arith.constant 0 : index
    %c16 = arith.constant 16 : index
    %80 = vector.load %arg8[%c0_28, %c16] : memref<8x32xf32, #tpu.memory_space<vmem>>, vector<8x8xf32>
    tpu.vector_store %arg8[%c0_28, %c16], %79 {strides = array<i32>} : memref<8x32xf32, #tpu.memory_space<vmem>>, vector<8x8xf32>,
    %81 = vector.extract_strided_slice %8 {offsets = [0, 24], sizes = [8, 8], strides = [1, 1]} : vector<8x96xf32> to vector<8x8xf32>
    %82 = vector.shape_cast %81 : vector<8x8xf32> to vector<1x8x8xf32>
    %83 = vector.extract_strided_slice %8 {offsets = [0, 56], sizes = [8, 8], strides = [1, 1]} : vector<8x96xf32> to vector<8x8xf32>
    %84 = vector.shape_cast %83 : vector<8x8xf32> to vector<1x8x8xf32>
    %85 = vector.extract_strided_slice %8 {offsets = [0, 88], sizes = [8, 8], strides = [1, 1]} : vector<8x96xf32> to vector<8x8xf32>
    %86 = vector.shape_cast %85 : vector<8x8xf32> to vector<1x8x8xf32>
    "tpu.trace_start"() <{level = 10 : i32, message = "bqd,bkd->bqk"}> : () -> ()
    %cst_29 = arith.constant dense<0.000000e+00> : vector<1x8x8xf32>
    %87 = tpu.matmul %82, %84, %cst_29 {dimension_numbers = #tpu.dot_dimension_numbers<[2], [2], [1], [1], [0, 0, 0, 1, 1, 1], [0], [0]>} : vector<1x8x8xf32>, vector<1x8x8xf32>, vector<1x8x8xf32> -> vector<1x8x8xf32>
    "tpu.trace_stop"() : () -> ()
    %c3 = arith.constant 3 : index
    %c0_30 = arith.constant 0 : index
    %c0_31 = arith.constant 0 : index
    %88 = vector.load %arg4[%c3, %c0_30, %c0_31] : memref<4x8x8xf32, #tpu.memory_space<vmem>>, vector<1x8x8xf32>
    %89 = vector.shape_cast %88 : vector<1x8x8xf32> to vector<8x8xf32>
    %90 = vector.shape_cast %89 : vector<8x8xf32> to vector<1x8x8xf32>
    %91 = arith.addf %87, %90 : vector<1x8x8xf32>
    %cst_32 = arith.constant dense<0xFF800000> : vector<1x8xf32>
    %92 = vector.multi_reduction <maximumf>, %91, %cst_32 [2] : vector<1x8x8xf32> to vector<1x8xf32>
    %93 = vector.shape_cast %92 : vector<1x8xf32> to vector<1x8x1xf32>
    %94 = vector.broadcast %93 : vector<1x8x1xf32> to vector<1x8x8xf32>
    %95 = arith.subf %91, %94 : vector<1x8x8xf32>
    %96 = math.exp %95 : vector<1x8x8xf32>
    %cst_33 = arith.constant dense<0.000000e+00> : vector<1x8xf32>
    %97 = vector.multi_reduction <add>, %96, %cst_33 [2] : vector<1x8x8xf32> to vector<1x8xf32>
    %98 = vector.shape_cast %97 : vector<1x8xf32> to vector<1x8x1xf32>
    %99 = tpu.reciprocal %98 {approx = true} : vector<1x8x1xf32> -> vector<1x8x1xf32>
    %100 = vector.broadcast %99 : vector<1x8x1xf32> to vector<1x8x8xf32>
    %101 = arith.mulf %96, %100 : vector<1x8x8xf32>
    "tpu.trace_start"() <{level = 10 : i32, message = "bqk,bkd->bqd"}> : () -> ()
    %cst_34 = arith.constant dense<0.000000e+00> : vector<1x8x8xf32>
    %102 = tpu.matmul %101, %86, %cst_34 {dimension_numbers = #tpu.dot_dimension_numbers<[2], [1], [1], [2], [0, 0, 0, 1, 1, 2], [0], [0]>} : vector<1x8x8xf32>, vector<1x8x8xf32>, vector<1x8x8xf32> -> vector<1x8x8xf32>
    "tpu.trace_stop"() : () -> ()
    %103 = vector.shape_cast %102 : vector<1x8x8xf32> to vector<8x8xf32>
    %c0_35 = arith.constant 0 : index
    %c24 = arith.constant 24 : index
    %104 = vector.load %arg8[%c0_35, %c24] : memref<8x32xf32, #tpu.memory_space<vmem>>, vector<8x8xf32>
    tpu.vector_store %arg8[%c0_35, %c24], %103 {strides = array<i32>} : memref<8x32xf32, #tpu.memory_space<vmem>>, vector<8x8xf32>,
    %c0_36 = arith.constant 0 : index
    %c0_37 = arith.constant 0 : index
    %105 = vector.load %arg8[%c0_36, %c0_37] : memref<8x32xf32, #tpu.memory_space<vmem>>, vector<8x32xf32>
    %c0_38 = arith.constant 0 : index
    %c0_39 = arith.constant 0 : index
    %106 = vector.load %arg5[%c0_38, %c0_39] : memref<32x32xf32, #tpu.memory_space<vmem>>, vector<32x32xf32>
    %cst_40 = arith.constant dense<0.000000e+00> : vector<8x32xf32>
    %107 = tpu.matmul %105, %106, %cst_40 {dimension_numbers = #tpu.dot_dimension_numbers<[1], [0], [0], [1], [0, 0, 1, 1], [], []>} : vector<8x32xf32>, vector<32x32xf32>, vector<8x32xf32> -> vector<8x32xf32>
    %c0_41 = arith.constant 0 : index
    %c0_42 = arith.constant 0 : index
    %108 = vector.load %arg6[%c0_41, %c0_42] : memref<1x32xf32, #tpu.memory_space<vmem>>, vector<1x32xf32>
    %109 = vector.shape_cast %108 : vector<1x32xf32> to vector<32xf32>
    %110 = vector.shape_cast %109 : vector<32xf32> to vector<1x32xf32>
    %111 = vector.broadcast %110 : vector<1x32xf32> to vector<8x32xf32>
    %112 = arith.addf %107, %111 : vector<8x32xf32>
    %113 = vector.shape_cast %112 : vector<8x32xf32> to vector<1x1x8x32xf32>
    %c0_43 = arith.constant 0 : index
    %c0_44 = arith.constant 0 : index
    %c0_45 = arith.constant 0 : index
    %c0_46 = arith.constant 0 : index
    %114 = vector.load %arg7[%c0_43, %c0_44, %c0_45, %c0_46] : memref<1x1x8x32xf32, #tpu.memory_space<vmem>>, vector<1x1x8x32xf32>
    tpu.vector_store %arg7[%c0_43, %c0_44, %c0_45, %c0_46], %113 {strides = array<i32>} : memref<1x1x8x32xf32, #tpu.memory_space<vmem>>, vector<1x1x8x32xf32>,
    return
  }
  func.func @transform_0(%arg0: i32) -> (i32, i32, i32) {
    %c0_i32 = arith.constant 0 : i32
    %c0_i32_0 = arith.constant 0 : i32
    %c0_i32_1 = arith.constant 0 : i32
    return %arg0, %c0_i32, %c0_i32_0 : i32, i32, i32
  }
  func.func @transform_1(%arg0: i32) -> (i32, i32) {
    %c0_i32 = arith.constant 0 : i32
    %c0_i32_0 = arith.constant 0 : i32
    %c0_i32_1 = arith.constant 0 : i32
    return %c0_i32, %c0_i32_0 : i32, i32
  }
  func.func @transform_2(%arg0: i32) -> (i32, i32) {
    %c0_i32 = arith.constant 0 : i32
    %c0_i32_0 = arith.constant 0 : i32
    %c0_i32_1 = arith.constant 0 : i32
    return %c0_i32, %c0_i32_0 : i32, i32
  }
  func.func @transform_3(%arg0: i32) -> (i32, i32, i32) {
    %c0_i32 = arith.constant 0 : i32
    %c0_i32_0 = arith.constant 0 : i32
    %c0_i32_1 = arith.constant 0 : i32
    %c0_i32_2 = arith.constant 0 : i32
    return %c0_i32, %c0_i32_0, %c0_i32_1 : i32, i32, i32
  }
  func.func @transform_4(%arg0: i32) -> (i32, i32) {
    %c0_i32 = arith.constant 0 : i32
    %c0_i32_0 = arith.constant 0 : i32
    %c0_i32_1 = arith.constant 0 : i32
    return %c0_i32, %c0_i32_0 : i32, i32
  }
  func.func @transform_5(%arg0: i32) -> (i32, i32) {
    %c0_i32 = arith.constant 0 : i32
    %c0_i32_0 = arith.constant 0 : i32
    %c0_i32_1 = arith.constant 0 : i32
    return %c0_i32, %c0_i32_0 : i32, i32
  }
  func.func @transform_6(%arg0: i32) -> (i32, i32, i32, i32) {
    %c0_i32 = arith.constant 0 : i32
    %c0_i32_0 = arith.constant 0 : i32
    %c0_i32_1 = arith.constant 0 : i32
    %c0_i32_2 = arith.constant 0 : i32
    return %arg0, %c0_i32, %c0_i32_0, %c0_i32_1 : i32, i32, i32, i32
  }
}

</mosaic_0001>

<bundles_post_ra>
// kernel: tpu_custom_call.1
= control target key start
LH: loop header
LB: loop body
LE: loop exit
PB: predicated region body
PF: predicated region fallthrough
CT: control target
= control target key end

     0   :  { %11 = vsyncpa [#allocation4], 0  ;;  %s2118_s0 = inlined_call_operand.hbm [shape: f32[4,8,32], index: 0, kind: input, shape index: {}]   ;;  %s2119_s1 = inlined_call_operand.hbm [shape: f32[32,96], index: 1, kind: input, shape index: {}]   ;;  %s2120_s2 = inlined_call_operand.vmem [shape: f32[1,96], index: 2, kind: input, shape index: {}]   ;;  %s2121_s3 = inlined_call_operand.hbm [shape: f32[4,8,8], index: 3, kind: input, shape index: {}]   ;;  %s2122_s4 = inlined_call_operand.hbm [shape: f32[32,32], index: 4, kind: input, shape index: {}]   ;;  %s2123_s5 = inlined_call_operand.vmem [shape: f32[1,32], index: 5, kind: input, shape index: {}]   ;;  %s2124_s6 = inlined_call_operand.hbm [shape: f32[4,1,8,32], index: 6, kind: output, shape index: {}]  }
   0x1   :  { %13 = vsyncpa [#allocation4 + $0x1], 0 }
   0x2   :  { %14 = vsyncpa [#allocation7], 0 }
   0x3   :  { %15 = vsyncpa [#allocation10], 0 }
   0x4   :  { %16 = vsyncpa [#allocation5], 0 }
   0x5   :  { %18 = vsyncpa [#allocation5 + $0x1], 0  ;;  %s1777_s21 = smov 0   ;;  %s1779_s22 = smov 0  }
   0x6   :  { %s1781_s23 = smov 0   ;;  %s1783_s24 = smov 0  }
   0x7 LB: > { %s1798_s25 = sadd.s32 4294967295, %s1716_s24   ;;  %s1282_s26 = sadd.s32 4294967294, %s1716_s24   ;;  %s1716_s24 = sphi %s1783_s24, %s2146_s24   ;;  %s1712_s23 = sphi %s1781_s23, %s2145_s23   ;;  %s1708_s22 = sphi %s1779_s22, %s2144_s22   ;;  %s1704_s21 = sphi %s1777_s21, %s2143_s21  }
   0x8   : > { %p44_p0 = scmp.ne.s32.totalorder %s1708_s22, %s1704_s21  ;;  %p2125_p1 = scmp.eq.s32.totalorder %s1798_s25, 0 }
   0x9   : > { %p179_p3 = scmp.eq.s32.totalorder %s1282_s26, 3  ;;  %p1283_p5 = scmp.ge.s32.totalorder %s1716_s24, 1 }
   0xa   : > { %p1807_p4 = por %p2125_p1, %p44_p0  ;;  %p186_p7 = scmp.lt.s32.totalorder %s1716_s24, 5 }
   0xb   : > { %p1812_p6 = por %p179_p3, %p44_p0  ;;  %s1718_s30 = smov [#allocation6]  }
   0xc   : > { %s2128_s27 = scalar_select %p1807_p4, 1, 0 }
   0xd   : > { %s2129_s28 = scalar_select %p1812_p6, 1, 0 }
   0xe   : > { %p1817_p8 = pnand %p1283_p5, %p186_p7  ;;  %s198_s7 = sshll.u32 %s1718_s30, 4  ;;  %s1821_s7 = int_to_ptr.vmem [resolvable:$true] %s198_s7 }
   0xf   : > { %s1719_s9 = smov [#allocation8]   ;;  %s1720_s11 = smov [#allocation9]  }
  0x10   : > { %s2130_s29 = scalar_select %p1817_p8, 1, 0 }
  0x11   : > { %p1432_p9 = pneg %p1817_p8  ;;  %s214_s10 = sshll.u32 %s1719_s9, 4  ;;  %s1831_s10 = int_to_ptr.vmem [resolvable:$true] %s214_s10 }
  0x12   : > { %s1833_s12 = sshll.u32 %s1720_s11, 4  ;;  %s1528_s15 = scalar_lea.hbm %s2119_s1, 512  ;;  %s228_s12 = int_to_ptr.vmem [resolvable:$true] %s1833_s12 }
  0x13   : > { %p1827_p10 = pnand %p1432_p9, %p2125_p1  ;;  %p1529_p11 = scmp.ne.s32.totalorder %s2119_s1, %s1528_s15 }
  0x14   : > { %p1535_p3 = scmp.lt.u32.totalorder %s1528_s15, %s2119_s1 }
  0x15   : > { %p1843_p12 = pneg %p1827_p10 }
  0x17   : > { %p1531_p13 = pnand %p1843_p12, %p1529_p11 }
  0x19   : > { %p1532_p0 = pneg %p1531_p13 }
  0x1b   : > { %p1537_p5 = pnand %p1535_p3, %p1532_p0 }
  0x1d   : > { %1540 = shalt.err (!%p1537_p5)
}
  0x1e   : > { %s1541_s26 = scalar_lea.vmem %s1821_s7, 512  ;;  %p1549_p2 = scmp.lt.s32.totalorder %s1821_s7, %s1821_s7 }
  0x1f   : > { %p1542_p7 = scmp.ne.s32.totalorder %s1821_s7, %s1541_s26  ;;  %p1550_p6 = scmp.lt.s32.totalorder %s1541_s26, %s1541_s26 }
  0x21   : > { %p1544_p9 = pnand %p1542_p7, %p1843_p12  ;;  %p1551_p11 = por %p1550_p6, %p1549_p2 }
  0x23   : > { %p1545_p1 = pneg %p1544_p9 }
  0x25   : > { %p1552_p13 = pnand %p1551_p11, %p1545_p1 }
  0x27   : > { %1555 = shalt.err (!%p1552_p13)
}
  0x28   : > { %s1721_s30 = smov 128   ;;  %s1722_s9 = smov 8  }
  0x29   : > { %1435 = dma.hbm_to_vmem [thread:$0]  (!%p1827_p10), %s2119_s1, 512, %s1821_s7, [#allocation7], %s1721_s30, %s1721_s30, %s1722_s9  }
  0x2a   : > { %s1556_s16 = scalar_lea.hbm %s2121_s3, 512 }
  0x2b   : > { %p1557_p1 = scmp.ne.s32.totalorder %s2121_s3, %s1556_s16  ;;  %p1563_p0 = scmp.lt.u32.totalorder %s1556_s16, %s2121_s3 }
  0x2d   : > { %p1559_p2 = pnand %p1557_p1, %p1843_p12 }
  0x2f   : > { %p1560_p6 = pneg %p1559_p2 }
  0x31   : > { %p1565_p3 = pnand %p1563_p0, %p1560_p6 }
  0x33   : > { %1568 = shalt.err (!%p1565_p3)
}
  0x34   : > { %s1569_s7 = scalar_lea.vmem %s1831_s10, 512  ;;  %p1577_p11 = scmp.lt.s32.totalorder %s1831_s10, %s1831_s10 }
  0x35   : > { %p1570_p5 = scmp.ne.s32.totalorder %s1831_s10, %s1569_s7  ;;  %p1578_p13 = scmp.lt.s32.totalorder %s1569_s7, %s1569_s7 }
  0x37   : > { %p1572_p7 = pnand %p1570_p5, %p1843_p12  ;;  %p1579_p1 = por %p1578_p13, %p1577_p11 }
  0x39   : > { %p1573_p9 = pneg %p1572_p7 }
  0x3b   : > { %p1580_p2 = pnand %p1579_p1, %p1573_p9 }
  0x3d   : > { %1583 = shalt.err (!%p1580_p2)
}
  0x3e   : > { %1438 = dma.hbm_to_vmem [thread:$0]  (!%p1827_p10), %s2121_s3, 512, %s1831_s10, [#allocation7], %s1721_s30, %s1721_s30, %s1722_s9  }
  0x3f   : > { %s1584_s16 = scalar_lea.hbm %s2122_s4, 512 }
  0x40   : > { %p1585_p6 = scmp.ne.s32.totalorder %s2122_s4, %s1584_s16  ;;  %p1591_p5 = scmp.lt.u32.totalorder %s1584_s16, %s2122_s4 }
  0x42   : > { %p1587_p0 = pnand %p1585_p6, %p1843_p12 }
  0x44   : > { %p1588_p3 = pneg %p1587_p0 }
  0x46   : > { %p1593_p7 = pnand %p1591_p5, %p1588_p3 }
  0x48   : > { %1596 = shalt.err (!%p1593_p7)
}
  0x49   : > { %s1597_s7 = scalar_lea.vmem %s228_s12, 512  ;;  %p1605_p1 = scmp.lt.s32.totalorder %s228_s12, %s228_s12 }
  0x4a   : > { %p1598_p9 = scmp.ne.s32.totalorder %s228_s12, %s1597_s7  ;;  %p1606_p2 = scmp.lt.s32.totalorder %s1597_s7, %s1597_s7 }
  0x4c   : > { %p1600_p11 = pnand %p1598_p9, %p1843_p12  ;;  %p1607_p4 = por %p1606_p2, %p1605_p1 }
  0x4e   : > { %p1601_p13 = pneg %p1600_p11 }
  0x50   : > { %p1608_p8 = pnand %p1607_p4, %p1601_p13 }
  0x52   : > { %1611 = shalt.err (!%p1608_p8)
}
  0x53   : > { %1441 = dma.hbm_to_vmem [thread:$0]  (!%p1827_p10), %s2122_s4, 512, %s228_s12, [#allocation10], %s1721_s30, %s1721_s30, %s1722_s9  }
  0x54   : > { %s1916_s18 = sadd.s32 1, %s1716_s24   ;;  %s31_s13 = sadd.s32 1, %s1712_s23 }
  0x55   : > { %s28_s8 = ssub.s32 %s1716_s24, %s1916_s18  ;;  %p38_p8 = scmp.ne.s32.totalorder %s1712_s23, %s1708_s22 }
  0x56   : > { %p29_p4 = scmp.eq.s32.totalorder %s28_s8, 0  ;;  %p39_p12 = scmp.eq.s32.totalorder %s1716_s24, 0 }
  0x57   : > { %p1453_p6 = scmp.lt.s32.totalorder %s1716_s24, 4  ;;  %p2133_p3 = scmp.eq.s32.totalorder %s1798_s25, 3 }
  0x58   : > { %s1926_s14 = scalar_select %p29_p4, %s1712_s23, %s31_s13  }
  0x59   : > { %p40_p0 = por %p39_p12, %p38_p8  ;;  %p1930_p5 = por %p2133_p3, %p38_p8 }
  0x5a   : > { %s244_s16 = sand.u32 1, %s1712_s23   ;;  %s1289_s17 = sshll.u32 %s1716_s24, 7 }
  0x5b   : > { %s1288_s12 = sshll.u32 %s244_s16, 3  ;;  %s1939_s19 = scalar_lea.hbm %s2118_s0, %s1289_s17 }
  0x5c   : > { %s248_s20 = scalar_lea.vmem [#allocation3], %s1288_s12  ;;  %p1941_p10 = pnand %p1453_p6, %p40_p0 }
  0x5d   : > { %s255_s26 = sshll.u32 %s248_s20, 4  ;;  %s245_s10 = scalar_lea.sflag [#allocation4], %s244_s16  ;;  %s1945_s26 = int_to_ptr.vmem [resolvable:$true] %s255_s26 }
  0x5e   : > { %s1612_s11 = scalar_lea.hbm %s1939_s19, 128  ;;  %p1614_p9 = pneg %p1941_p10 }
  0x5f   : > { %p1613_p7 = scmp.ne.s32.totalorder %s1939_s19, %s1612_s11  ;;  %s1617_s17 = scalar_lea.hbm %s2118_s0, 512 }
  0x60   : > { %p1618_p1 = scmp.lt.u32.totalorder %s1939_s19, %s2118_s0  ;;  %p1619_p2 = scmp.lt.u32.totalorder %s1617_s17, %s1612_s11 }
  0x61   : > { %p1615_p11 = pnand %p1614_p9, %p1613_p7  ;;  %p1621_p8 = scmp.lt.u32.totalorder %s1612_s11, %s1939_s19 }
  0x62   : > { %p1620_p4 = por %p1619_p2, %p1618_p1 }
  0x63   : > { %p1616_p13 = pneg %p1615_p11 }
  0x64   : > { %p1622_p12 = por %p1621_p8, %p1620_p4 }
  0x66   : > { %p1623_p6 = pnand %p1622_p12, %p1616_p13 }
  0x68   : > { %1626 = shalt.err (!%p1623_p6)
}
  0x69   : > { %s1627_s16 = scalar_lea.vmem %s1945_s26, 128  ;;  %s1723_s9 = smov [#allocation3]  }
  0x6a   : > { %p1628_p0 = scmp.ne.s32.totalorder %s1945_s26, %s1627_s16  ;;  %s1632_s20 = sshll.u32 %s1723_s9, 4  ;;  %s1633_s20 = int_to_ptr.vmem [resolvable:$false] %s1632_s20 }
  0x6b   : > { %s1634_s8 = scalar_lea.vmem %s1633_s20, 256  ;;  %p1635_p11 = scmp.lt.s32.totalorder %s1945_s26, %s1633_s20 }
  0x6c   : > { %p1630_p3 = pnand %p1628_p0, %p1614_p9  ;;  %p1636_p1 = scmp.lt.s32.totalorder %s1634_s8, %s1627_s16 }
  0x6e   : > { %p1631_p7 = pneg %p1630_p3  ;;  %p1637_p2 = por %p1636_p1, %p1635_p11 }
  0x70   : > { %p1638_p4 = pnand %p1637_p2, %p1631_p7 }
  0x72   : > { %1641 = shalt.err (!%p1638_p4)
}
  0x73   : > { %1445 = dma.hbm_to_vmem [thread:$0]  (!%p1941_p10), %s1939_s19, 128, %s1945_s26, %s245_s10  }
  0x74   : > { %p2136_p13 = scmp.ne.s32.totalorder %s2130_s29, 0 }
  0x75   : > { %s1975_s11 = sand.u32 (!%p2136_p13), 1, %s1708_s22   ;;  %p2137_p9 = scmp.ne.s32.totalorder (!%p2136_p13), %s2128_s27, 0 }
  0x76   : > { %264 = sbr.rel (%p2136_p13) target bundleno = 2147 (0x863), region = 44  ;;  %s1291_s13 = sshll.u32 (!%p2136_p13), %s1975_s11, 3 }
  0x77   : > { %s267_s17 = scalar_lea.sflag (!%p2136_p13), [#allocation4], %s1975_s11  ;;  %s270_s12 = scalar_lea.vmem (!%p2136_p13), [#allocation3], %s1291_s13 }
  0x7d   : > { %1687 = dma.done.wait (%p2137_p9), %s267_s17, 128  }
  0x7e   : > { %1689 = vsyncadd (%p2137_p9), %s267_s17, 4294967168  ;;  %p2138_p10 = scmp.eq.s32.totalorder %s1798_s25, 0 }
  0x80   : > { %1691 = dma.done.wait (%p2138_p10), [#allocation7], 1024   ;;  %p2139_p8 = pmov %p2138_p10 }
  0x82   : > { %1693 = vsyncadd (%p2139_p8), [#allocation7], 4294966272  ;;  %p2140_p12 = pmov %p2139_p8 }
  0x83   : > { %p2141_p6 = pmov %p2139_p8 }
  0x84   : > { %1695 = dma.done.wait (%p2140_p12), [#allocation10], 512  }
  0x85   : > { %1697 = vsyncadd (%p2141_p6), [#allocation10], 4294966784  ;;  %v1724_v0 = vmov 0.0|0.0   ;;  %vm1725_vm0 = vmmov 0   ;;  %v1726_v1 = vmov 0.0   ;;  %v312_v2 = vld [vmem:[#allocation6] sm:$0xff] }
  0x86   : > { %1404 = vmatprep.subr.bf16.mxu0 %v1724_v0  ;;  %1350 = vmatprep.mubr.msk.f32.mxu0 %vm1725_vm0, %v1726_v1  ;;  %v313_v3 = vld [vmem:[#allocation6 + $0x8] sm:$0xff]  ;;  %v314_v4 = vld [vmem:[#allocation6 + $0x10] sm:$0xff]  ;;  %v315_v6 = vld [vmem:[#allocation6 + $0x18] sm:$0xff]  ;;  %vm323_vm1 = vcmask 261120   ;;  %s1727_s19 = smov 64   ;;  %s1728_s26 = smov 96  }
  0x87   : > { %1353 = vmatprep.subr.mxu1 %v1726_v1  ;;  %1355 = vmatprep.mubr.msk.f32.mxu1 %vm1725_vm0, %v1726_v1  ;;  %v1405_v5 = vpack.c.bf16 %v313_v3, %v312_v2  ;;  %v1408_v7 = vpack.c.bf16 %v315_v6, %v314_v4  ;;  %v311_v8 = vld [vmem:[%s270_s12] sm:$0xff]  ;;  %v1296_v9 = vld [vmem:[%s2120_s2] ss:$0 sm:$0xff]  ;;  %s1729_s7 = smov 88   ;;  %s1730_s10 = smov 120   ;;  %vm401_vm2 = vcmask 64512  }
  0x88   : > { %s1731_s30 = smov 80   ;;  %v397_v18 = vld [vmem:[#allocation8] sm:$0xff]  ;;  %s1732_s16 = smov 72   ;;  %v738_v34 = vld [vmem:[#allocation8 + $0x10] sm:$0xff]  ;;  %v565_v43 = vld [vmem:[#allocation8 + $0x8] sm:$0xff]  ;;  %vm735_vm3 = vcmask 130112  }
  0x89   : > { %1406 = vmatpush3.bf16.msra.mxu0 %v1405_v5  ;;  %s1733_s9 = smov 112   ;;  %s1734_s20 = smov 104   ;;  %v911_v44 = vld [vmem:[#allocation8 + $0x18] sm:$0xff]  ;;  %vm908_vm4 = vcmask 195712   ;;  %vm1081_vm5 = vcmask 261312  }
  0x8a   : > { %1407 = vmatprep.subr.bf16.mxu0 %v1724_v0  ;;  %s1735_s8 = smov 56   ;;  %s1736_s17 = smov 48  }
  0x8b   : > { %s1737_s12 = smov 40   ;;  %s1738_s27 = smov 8  }
  0x8c   : > { %s1739_s29 = smov 16  }
  0x8d   : > { %1409 = vmatpush3.bf16.msra.mxu0 %v1408_v7 }
  0x8e   : > { %1373 = vmatprep.subr.mxu0 %v1726_v1 }
  0x90   : > { %1351 = vmatmul.mubr.msk.f32.vlgmr.msra.gmra.mrb[0].mxu0 %vm323_vm1, %v311_v8 }
  0x91   : > { %1375 = vmatprep.mubr.msk.f32.mxu0 %vm1725_vm0, %v1726_v1 }
 0x163   : > { %v393_v10 = vpop.f32.mrb[0].mxu0 }
 0x164   : > { %v2007_v11 = vadd.f32 %v1296_v9, %v393_v10  ;;  %v1352_v12 = vpop.f32.mrb[1].mxu0 }
 0x166   : > { %487 = vrot.lane.b32.xlu1 %v2007_v11, %s1727_s19  ;;  %399 = vrot.lane.b32.xlu0 %v2007_v11, %s1728_s26  ;;  %s1740_s19 = smov 24  }
 0x16a   : > { %568 = vrot.lane.b32.xlu1 %v2007_v11, %s1729_s7 }
 0x16e   : > { %566 = vrot.lane.b32.xlu1 %v2007_v11, %s1730_s10  ;;  %s1313_s10 = sshll.u32 %s1798_s25, 7 }
 0x172   : > { %741 = vrot.lane.b32.xlu1 %v2007_v11, %s1731_s30  ;;  %s310_s30 = scalar_lea.vmem [#allocation11], %s1291_s13  ;;  %s1741_s13 = smov [#allocation11]  }
 0x1d8   : > { %v488_v13 = vpop.permute.xlu1 %487  ;;  %v400_v14 = vpop.permute.xlu0 %399 }
 0x1d9   : > { %1354 = vmatpush3.xpose.msk.msra.mxu1 %vm401_vm2, %v400_v14 }
 0x1da   : > { %1358 = vmatprep.subr.mxu1 %v1726_v1 }
 0x1dc   : > { %v569_v15 = vpop.permute.xlu1 %568  ;;  %1356 = vmatmul.mubr.msk.f32.vlgmr.msra.gmra.mrb[0].mxu1 %vm401_vm2, %v2007_v11 }
 0x1dd   : > { %1359 = vmatpush3.msra.mxu1 %v488_v13  ;;  %1360 = vmatprep.mubr.msk.f32.mxu1 %vm1725_vm0, %v1726_v1 }
 0x1de   : > { %1363 = vmatprep.subr.mxu1 %v1726_v1 }
 0x1e0   : > { %v567_v16 = vpop.permute.xlu1 %566 }
 0x1e4   : > { %v742_v17 = vpop.permute.xlu1 %741 }
 0x1e5   : > { %1374 = vmatpush3.xpose.msk.msra.mxu0 %vm401_vm2, %v742_v17  ;;  %v1085_v17 = vld [vmem:[#allocation9 + $0x8] sm:$0xff] }
 0x1e6   : > { %1383 = vmatprep.subr.mxu0 %v1726_v1 }
 0x2af   : > { %v472_v19 = vpop.f32.mrb[0].mxu1 }
 0x2b0   : > { %v473_v20 = vadd.f32 %v472_v19, %v397_v18  ;;  %v1357_v21 = vpop.f32.mrb[1].mxu1  ;;  %v1086_v19 = vld [vmem:[#allocation9 + $0x10] sm:$0xff] }
 0x2b2   : > { %v476_v22 = vsel %vm401_vm2, %v473_v20, -inf }
 0x2b3   : > { %477 = vmax.xlane.f32.xlu0 %v476_v22 }
 0x2c9   : > { %914 = vrot.lane.b32.xlu0 %v2007_v11, %s1732_s16  ;;  %s1183_s16 = sshll.u32 %s310_s30, 4  ;;  %s2076_s16 = int_to_ptr.vmem [resolvable:$true] %s1183_s16 }
 0x2ca   : > { %s1642_s25 = scalar_lea.vmem %s2076_s16, 128 }
 0x2cb   : > { %p1643_p0 = scmp.ne.s32.totalorder %s2076_s16, %s1642_s25 }
 0x2cd   : > { %p1644_p3 = pnand %p1643_p0, %p1930_p5 }
 0x2cf   : > { %p1645_p7 = pneg %p1644_p3 }
 0x340   : > { %v478_v23 = vpop.xlane.xlu0 %477 }
 0x341   : > { %v479_v24 = vsub.f32 %v473_v20, %v478_v23  ;;  %v1087_v20 = vld [vmem:[#allocation9 + $0x18] sm:$0xff] }
 0x342   : > { %v1414_v21 = vpack.c.bf16 %v1087_v20, %v1086_v19 }
 0x343   : > { %v480_v25 = vmul.f32 1.442695, %v479_v24 }
 0x344   : > { %v915_v30 = vpop.permute.xlu0 %914 }
 0x345   : > { %1512 = vpow2.f32 %v480_v25 }
 0x34f   : > { %v1513_v26 = vpop.eup %1512 }
 0x350   : > { %v482_v27 = vsel %vm401_vm2, %v1513_v26, 0.0 }
 0x351   : > { %483 = vadd.xlane.f32.xlu1 %v482_v27 }
 0x362   : > { %739 = vrot.lane.b32.xlu1 %v2007_v11, %s1733_s9 }
 0x366   : > { %912 = vrot.lane.b32.xlu1 %v2007_v11, %s1734_s20 }
 0x3de   : > { %v484_v28 = vpop.xlane.xlu1 %483 }
 0x3df   : > { %1514 = vrcp.f32 %v484_v28 }
 0x3e2   : > { %v740_v29 = vpop.permute.xlu1 %739 }
 0x3e3   : > { %1376 = vmatmul.mubr.msk.f32.vlgmr.msra.gmra.mrb[2].mxu0 %vm401_vm2, %v740_v29 }
 0x3e4   : > { %1384 = vmatpush3.xpose.msk.msra.mxu0 %vm401_vm2, %v915_v30  ;;  %1385 = vmatprep.mubr.msk.f32.mxu0 %vm1725_vm0, %v1726_v1  ;;  %v1310_v30 = vld [vmem:[%s2123_s5] ss:$0 sm:$0xff] }
 0x3e5   : > { %1410 = vmatprep.subr.bf16.mxu0 %v1724_v0 }
 0x3e6   : > { %v913_v31 = vpop.permute.xlu1 %912 }
 0x3e7   : > { %1386 = vmatmul.mubr.msk.f32.vlgmr.msra.gmra.mrb[4].mxu0 %vm401_vm2, %v913_v31 }
 0x3e8   : > { %1401 = vmatprep.mubr.msk.f32.mxu0 %vm1725_vm0, %v1726_v1 }
 0x3e9   : > { %v1515_v32 = vpop.eup %1514 }
 0x3ea   : > { %v486_v33 = vmul.f32 %v1515_v32, %v1513_v26 }
 0x3ec   : > { %1361 = vmatmul.mubr.msk.f32.vlgmr.msra.gmra.mrb[2].mxu1 %vm401_vm2, %v486_v33 }
 0x3ed   : > { %1364 = vmatpush3.xpose.msk.msra.mxu1 %vm401_vm2, %v569_v15  ;;  %1365 = vmatprep.mubr.msk.f32.mxu1 %vm1725_vm0, %v1726_v1 }
 0x3ee   : > { %1368 = vmatprep.subr.mxu1 %v1726_v1 }
 0x3f0   : > { %1366 = vmatmul.mubr.msk.f32.vlgmr.msra.gmra.mrb[4].mxu1 %vm401_vm2, %v567_v16  ;;  %v1084_v16 = vld [vmem:[#allocation9] sm:$0xff] }
 0x3f1   : > { %1370 = vmatprep.mubr.msk.f32.mxu1 %vm1725_vm0, %v1726_v1  ;;  %v1411_v18 = vpack.c.bf16 %v1085_v17, %v1084_v16 }
 0x3f3   : > { %1412 = vmatpush3.bf16.msra.mxu0 %v1411_v18 }
 0x3f4   : > { %1413 = vmatprep.subr.bf16.mxu0 %v1724_v0 }
 0x3f7   : > { %1415 = vmatpush3.bf16.msra.mxu0 %v1414_v21 }
 0x4b6   : > { %v813_v35 = vpop.f32.mrb[2].mxu0 }
 0x4b7   : > { %v814_v36 = vadd.f32 %v813_v35, %v738_v34  ;;  %v1377_v37 = vpop.f32.mrb[3].mxu0 }
 0x4b9   : > { %v817_v38 = vsel %vm401_vm2, %v814_v36, -inf }
 0x4ba   : > { %818 = vmax.xlane.f32.xlu0 %v817_v38  ;;  %v986_v39 = vpop.f32.mrb[4].mxu0 }
 0x4bb   : > { %v1387_v40 = vpop.f32.mrb[5].mxu0  ;;  %v987_v48 = vadd.f32 %v986_v39, %v911_v44 }
 0x4bd   : > { %v990_v50 = vsel %vm401_vm2, %v987_v48, -inf }
 0x4bf   : > { %v559_v41 = vpop.f32.mrb[2].mxu1 }
 0x4c0   : > { %563 = vst.msk [vmem:[#allocation2] sm:$0xff] %vm401_vm2, %v559_v41  ;;  %v1362_v42 = vpop.f32.mrb[3].mxu1 }
 0x4c3   : > { %v640_v45 = vpop.f32.mrb[4].mxu1 }
 0x4c4   : > { %v641_v46 = vadd.f32 %v640_v45, %v565_v43  ;;  %v1367_v47 = vpop.f32.mrb[5].mxu1 }
 0x4c6   : > { %v644_v49 = vsel %vm401_vm2, %v641_v46, -inf }
 0x4c7   : > { %645 = vmax.xlane.f32.xlu1 %v644_v49 }
 0x4cb   : > { %991 = vmax.xlane.f32.xlu1 %v990_v50 }
 0x547   : > { %v819_v51 = vpop.xlane.xlu0 %818 }
 0x548   : > { %v820_v52 = vsub.f32 %v814_v36, %v819_v51 }
 0x54a   : > { %v821_v53 = vmul.f32 1.442695, %v820_v52 }
 0x54c   : > { %1516 = vpow2.f32 %v821_v53 }
 0x554   : > { %v646_v54 = vpop.xlane.xlu1 %645 }
 0x555   : > { %v647_v62 = vsub.f32 %v641_v46, %v646_v54 }
 0x556   : > { %v1517_v55 = vpop.eup %1516 }
 0x557   : > { %v823_v56 = vsel %vm401_vm2, %v1517_v55, 0.0  ;;  %v648_v63 = vmul.f32 1.442695, %v647_v62 }
 0x558   : > { %824 = vadd.xlane.f32.xlu1 %v823_v56  ;;  %v992_v57 = vpop.xlane.xlu1 %991 }
 0x559   : > { %v993_v58 = vsub.f32 %v987_v48, %v992_v57 }
 0x55b   : > { %v994_v59 = vmul.f32 1.442695, %v993_v58 }
 0x55d   : > { %1518 = vpow2.f32 %v994_v59 }
 0x55e   : > { %1520 = vpow2.f32 %v648_v63 }
 0x567   : > { %v1519_v60 = vpop.eup %1518 }
 0x568   : > { %v996_v61 = vsel %vm401_vm2, %v1519_v60, 0.0  ;;  %v1521_v2 = vpop.eup %1520 }
 0x569   : > { %655 = vrot.lane.b32.xlu1 %v2007_v11, %s1735_s8  ;;  %997 = vadd.xlane.f32.xlu0 %v996_v61  ;;  %v650_v3 = vsel %vm401_vm2, %v1521_v2, 0.0  ;;  %s2074_s8 = scalar_lea.hbm %s2124_s6, %s1313_s10 }
 0x57f   : > { %828 = vrot.lane.b32.xlu0 %v2007_v11, %s1736_s17  ;;  %s1170_s17 = scalar_lea.sflag [#allocation5], %s1975_s11 }
 0x58d   : > { %651 = vadd.xlane.f32.xlu1 %v650_v3 }
 0x59e   : > { %1001 = vrot.lane.b32.xlu1 %v2007_v11, %s1737_s12  ;;  %s1646_s12 = sshll.u32 %s1741_s13, 4  ;;  %s1647_s12 = int_to_ptr.vmem [resolvable:$false] %s1646_s12 }
 0x59f   : > { %p1649_p11 = scmp.lt.s32.totalorder %s2076_s16, %s1647_s12 }
 0x5e5   : > { %v825_v4 = vpop.xlane.xlu1 %824 }
 0x5e9   : > { %v656_v5 = vpop.permute.xlu1 %655 }
 0x5ea   : > { %1369 = vmatpush3.msra.mxu1 %v656_v5 }
 0x5eb   : > { %1378 = vmatprep.subr.mxu1 %v1726_v1 }
 0x5f6   : > { %v998_v7 = vpop.xlane.xlu0 %997 }
 0x5fa   : > { %v829_v12 = vpop.permute.xlu0 %828 }
 0x61a   : > { %v652_v6 = vpop.xlane.xlu1 %651 }
 0x61b   : > { %1522 = vrcp.f32 %v652_v6 }
 0x61c   : > { %1524 = vrcp.f32 %v825_v4 }
 0x61d   : > { %1526 = vrcp.f32 %v998_v7 }
 0x61e   : > { %v1002_v14 = vpop.permute.xlu1 %1001 }
 0x625   : > { %v1523_v8 = vpop.eup %1522 }
 0x626   : > { %v654_v9 = vmul.f32 %v1523_v8, %v1521_v2  ;;  %v1525_v10 = vpop.eup %1524 }
 0x627   : > { %v827_v11 = vmul.f32 %v1525_v10, %v1517_v55  ;;  %v1527_v13 = vpop.eup %1526 }
 0x628   : > { %1371 = vmatmul.mubr.msk.f32.vlgmr.msra.gmra.mrb[6].mxu1 %vm401_vm2, %v654_v9  ;;  %v1000_v15 = vmul.f32 %v1527_v13, %v1519_v60 }
 0x629   : > { %1379 = vmatpush3.msra.mxu1 %v829_v12  ;;  %1380 = vmatprep.mubr.msk.f32.mxu1 %vm1725_vm0, %v1726_v1 }
 0x62a   : > { %1388 = vmatprep.subr.mxu1 %v1726_v1 }
 0x62c   : > { %1381 = vmatmul.mubr.msk.f32.vlgmr.msra.gmra.mrb[8].mxu1 %vm401_vm2, %v827_v11 }
 0x62d   : > { %1389 = vmatpush3.msra.mxu1 %v1002_v14  ;;  %1390 = vmatprep.mubr.msk.f32.mxu1 %vm1725_vm0, %v1726_v1 }
 0x630   : > { %1391 = vmatmul.mubr.msk.f32.vlgmr.msra.gmra.mrb[10].mxu1 %vm401_vm2, %v1000_v15 }
 0x6fb   : > { %v727_v22 = vpop.f32.mrb[6].mxu1 }
 0x6fc   : > { %732 = vrot.lane.b32.xlu1 %v727_v22, %s1738_s27  ;;  %v1372_v23 = vpop.f32.mrb[7].mxu1  ;;  %s1648_s27 = scalar_lea.vmem %s1647_s12, 256 }
 0x6fd   : > { %p1650_p1 = scmp.lt.s32.totalorder %s1648_s27, %s1642_s25 }
 0x6ff   : > { %v900_v24 = vpop.f32.mrb[8].mxu1  ;;  %p1651_p2 = por %p1650_p1, %p1649_p11 }
 0x700   : > { %905 = vrot.lane.b32.xlu0 %v900_v24, %s1739_s29  ;;  %v1382_v1 = vpop.f32.mrb[9].mxu1 }
 0x701   : > { %p1652_p4 = pnand %p1651_p2, %p1645_p7 }
 0x703   : > { %v1073_v25 = vpop.f32.mrb[10].mxu1 }
 0x704   : > { %1078 = vrot.lane.b32.xlu1 %v1073_v25, %s1740_s19  ;;  %v1392_v26 = vpop.f32.mrb[11].mxu1 }
 0x76e   : > { %v733_v27 = vpop.permute.xlu1 %732 }
 0x76f   : > { %736 = vst.msk [vmem:[#allocation2] sm:$0xff] %vm735_vm3, %v733_v27 }
 0x772   : > { %v906_v0 = vpop.permute.xlu0 %905 }
 0x773   : > { %909 = vst.msk [vmem:[#allocation2] sm:$0xff] %vm908_vm4, %v906_v0 }
 0x776   : > { %v1079_v28 = vpop.permute.xlu1 %1078 }
 0x777   : > { %1082 = vst.msk [vmem:[#allocation2] sm:$0xff] %vm1081_vm5, %v1079_v28 }
 0x77e   : > { %v1083_v29 = vld [vmem:[#allocation2] sm:$0xff] }
 0x77f   : > { %1402 = vmatmul.mubr.msk.f32.vlgmr.msra.gmra.mrb[6].mxu0 %vm323_vm1, %v1083_v29 }
 0x852   : > { %v1164_v31 = vpop.f32.mrb[6].mxu0 }
 0x853   : > { %v1165_v32 = vadd.f32 %v1310_v30, %v1164_v31  ;;  %v1403_v33 = vpop.f32.mrb[7].mxu0 }
 0x855   : > { %1168 = vst.msk [vmem:[%s310_s30] sm:$0xff] %vm323_vm1, %v1165_v32 }
 0x856   : > { %1655 = shalt.err (!%p1652_p4)
}
 0x857   : > { %s1656_s11 = scalar_lea.hbm %s2074_s8, 128  ;;  %s1660_s26 = scalar_lea.hbm %s2124_s6, 512 }
 0x858   : > { %p1657_p13 = scmp.ne.s32.totalorder %s2074_s8, %s1656_s11  ;;  %p1661_p8 = scmp.lt.u32.totalorder %s2074_s8, %s2124_s6 }
 0x859   : > { %p1662_p12 = scmp.lt.u32.totalorder %s1660_s26, %s1656_s11  ;;  %p1664_p0 = scmp.lt.u32.totalorder %s1656_s11, %s2074_s8 }
 0x85a   : > { %p1658_p9 = pnand %p1657_p13, %p1930_p5 }
 0x85b   : > { %p1663_p6 = por %p1662_p12, %p1661_p8 }
 0x85c   : > { %p1659_p10 = pneg %p1658_p9 }
 0x85d   : > { %p1665_p3 = por %p1664_p0, %p1663_p6 }
 0x85f   : > { %p1666_p7 = pnand %p1665_p3, %p1659_p10 }
 0x861   : > { %1669 = shalt.err (!%p1666_p7)
}
 0x862   : > { %1430 = dma.vmem_to_hbm [thread:$0]  (%p1930_p5), %s2076_s16, 128, %s2074_s8, %s1170_s17  }
 0x863 PF: > { %p1457_p11 = scmp.ge.s32.totalorder %s1716_s24, 2  ;;  %s1195_s30 = sand.u32 1, %s1704_s21  }
 0x864   : > { %p2142_p1 = scmp.ne.s32.totalorder %s2129_s28, 0  ;;  %s1196_s9 = scalar_lea.sflag [#allocation5], %s1195_s30 }
 0x866   : > { %p1447_p2 = pnand %p1457_p11, %p2142_p1 }
 0x868   : > { %1699 = dma.done.wait (!%p1447_p2), %s1196_s9, 128  }
 0x869   : > { %1701 = vsyncadd (!%p1447_p2), %s1196_s9, 4294967168  ;;  %p21_p4 = scmp.ge.s32.totalorder %s1916_s18, 6   ;;  %s2143_s21 = smov %s1708_s22 }
 0x86a   : > { %s2144_s22 = smov %s1712_s23  ;;  %s2145_s23 = smov %s1926_s14 }
 0x86b   : > { %s2146_s24 = smov %s1916_s18  ;;  %23 = sbr.rel (!%p21_p4) target bundleno = 7 (0x7), region = 104 }
 0x872   :  { %1201 = vsyncpa [#allocation4], 1 }
 0x873   :  { %1203 = vsyncpa [#allocation4 + $0x1], 1 }
 0x874   :  { %1204 = vsyncpa [#allocation7], 1 }
 0x875   :  { %1205 = vsyncpa [#allocation10], 1 }
 0x876   :  { %1206 = vsyncpa [#allocation5], 1 }
 0x877   :  { %1208 = vsyncpa [#allocation5 + $0x1], 1 }

</bundles_post_ra>
